<compile_context>
chip_gen: v7x
topology: tpu7x:2x2x1
jax: 0.10.0
libtpu: 0.0.40
codegen_flags: <defaults>
</compile_context>

<pallas_src>
import math
import functools

import numpy as np
import jax
import jax.numpy as jnp
from jax.experimental import pallas as pl
from jax.experimental.pallas import tpu as pltpu


def _attn_rows_kernel(*refs, inv_scale, clip, has_mask):
    """One grid step processes TR independent attention rows.

    Refs (in order):
      q_ref    : (TR, D)       query rows (trailing 1 squeezed in wrapper)
      k_ref    : (TR, N*D)     keys, lane-packed per row
      v_ref    : (TR, N*D)     values, lane-packed per row
      bias_ref : (TR, N)       additive mask bias (only if has_mask)
      tile_ref : (D, N*D)      one-hot: tiles q across n on the lane axis
      segd_ref : (N*D, N)      one-hot: segment-sum over d (QK logits)
      expn_ref : (N, N*D)      one-hot: expands probs across d
      segn_ref : (N*D, D)      one-hot: segment-sum over n (PV output)
      o_ref    : (TR, D)
    """
    if has_mask:
        (q_ref, k_ref, v_ref, bias_ref,
         tile_ref, segd_ref, expn_ref, segn_ref, o_ref) = refs
    else:
        (q_ref, k_ref, v_ref,
         tile_ref, segd_ref, expn_ref, segn_ref, o_ref) = refs
        bias_ref = None

    f32 = jnp.float32
    q = q_ref[...].astype(f32) * inv_scale            # (TR, D)  fold 1/scale into Q
    k = k_ref[...].astype(f32)                        # (TR, ND)
    v = v_ref[...].astype(f32)                        # (TR, ND)

    # q tiled across n on the lane axis (MXU; one-hot weights -> exact).
    qt = jnp.dot(q, tile_ref[...], preferred_element_type=f32)            # (TR, ND)
    # logits[r, n] = sum_d q[r, d] * k[r, n*D + d]  (full-lane VPU mul + MXU segsum)
    logits = jnp.dot(qt * k, segd_ref[...], preferred_element_type=f32)   # (TR, N)

    if clip is not None:
        logits = clip * jnp.tanh(logits)
    if has_mask:
        logits = logits + bias_ref[...]               # additive -1e10 bias (one add)

    # Numerically stable softmax over the lane axis (N).
    lmax = jnp.max(logits, axis=-1, keepdims=True)    # (TR, 1)
    e = jnp.exp(logits - lmax)                        # (TR, N)
    denom = jnp.sum(e, axis=-1, keepdims=True)        # (TR, 1)
    r = pl.reciprocal(denom, approx=True)             # EUP rcp (free slot)
    r = r * (2.0 - denom * r)                         # one Newton step -> f32 accuracy
    probs = e * r                                     # (TR, N)

    # out[r, d] = sum_n probs[r, n] * v[r, n*D + d]
    pe = jnp.dot(probs, expn_ref[...], preferred_element_type=f32)        # (TR, ND)
    out = jnp.dot(pe * v, segn_ref[...], preferred_element_type=f32)      # (TR, D)
    o_ref[...] = out.astype(o_ref.dtype)


def _pad128(x):
    return ((x + 127) // 128) * 128


def _vmem_budget_and_limit():
    """Generation-aware block budget (incl. double buffering) and VMEM limit."""
    cap = 64 * 1024 * 1024                   # conservative fallback (v7x per-TC)
    try:
        info = pltpu.get_tpu_info()
        v = getattr(info, "vmem_capacity_bytes", None)
        if v:
            cap = int(v)
    except Exception:
        pass
    budget = max(4 << 20, min(cap // 4, 32 << 20))
    limit = min(max(2 * budget, (3 * cap) // 4), cap - (2 << 20), 100 << 20)
    limit = max(limit, budget + (4 << 20))
    return budget, int(limit)


def _choose_rows(R, per_row_vmem_bytes, budget):
    """Pick TR (rows per block): as large as the budget allows, multiple of 8,
    but never collapsing a splittable problem to a single grid step (v7x)."""
    if R <= 8:
        return R
    fit = max(8, (int(budget // max(per_row_vmem_bytes, 1)) // 8) * 8)
    if fit >= R:
        # Whole problem fits in one block: still split into >=2 grid steps so
        # v7x's two TensorCores both get work (harmless on 1-TC chips).
        return max(8, ((((R + 1) // 2) + 7) // 8) * 8)
    return fit


def dot_product_attention(Q, K, V, mask=None, clip=None, head_depth=16):
    """Pallas implementation of DotProductAttention.forward (return_logits=False).

    Q: (B, H, C, 1, D)   K, V: (B, H, C, N, D)   mask: (B, C, N, 1) bool or None
    Returns: (B, H, C, 1, D)
    """
    B, H, C, one, D = Q.shape
    assert one == 1
    N = K.shape[3]
    ND = N * D
    R = B * H * C

    # Lane-dense repack: contiguous (free) reshapes. One row per (b, h, c);
    # rows cover full H and C contiguously -> long contiguous HBM runs per block.
    q2 = Q.reshape(R, D)
    k2 = K.reshape(R, ND)
    v2 = V.reshape(R, ND)

    has_mask = mask is not None
    args = [q2, k2, v2]
    if has_mask:
        # Additive bias: 0 where visible, -1e10 where masked.  Broadcast over
        # heads once in the wrapper (tiny vs K/V traffic), flattened to rows.
        mb = mask.astype(bool)[:, None, :, :, 0]                       # (B,1,C,N)
        bias = jnp.where(mb, jnp.float32(-1e10), jnp.float32(0.0))
        bias = jnp.broadcast_to(bias, (B, H, C, N)).reshape(R, N)
        args.append(bias)

    # Constant one-hot matrices for the MXU tiling / segment-sum contractions.
    eye_d = np.eye(D, dtype=np.float32)
    eye_n = np.eye(N, dtype=np.float32)
    tile_q = jnp.asarray(np.kron(np.ones((1, N), np.float32), eye_d))   # (D, ND)
    seg_d = jnp.asarray(np.kron(eye_n, np.ones((D, 1), np.float32)))    # (ND, N)
    exp_n = jnp.asarray(np.kron(eye_n, np.ones((1, D), np.float32)))    # (N, ND)
    seg_n = jnp.asarray(np.kron(np.ones((N, 1), np.float32), eye_d))    # (ND, D)
    args += [tile_q, seg_d, exp_n, seg_n]

    # Tile selection against a generation-aware VMEM budget.
    isz_kv = jnp.dtype(K.dtype).itemsize
    isz_q = jnp.dtype(Q.dtype).itemsize
    per_row = 2 * (_pad128(ND) * 2 * isz_kv          # K, V   (double-buffered)
                   + _pad128(D) * 2 * isz_q          # Q, out
                   + (_pad128(N) * 4 if has_mask else 0))
    budget, vmem_limit = _vmem_budget_and_limit()
    TR = _choose_rows(R, per_row, budget)
    grid = (pl.cdiv(R, TR),)

    in_specs = [
        pl.BlockSpec((TR, D), lambda i: (i, 0)),     # Q rows
        pl.BlockSpec((TR, ND), lambda i: (i, 0)),    # K rows (lane-packed)
        pl.BlockSpec((TR, ND), lambda i: (i, 0)),    # V rows (lane-packed)
    ]
    if has_mask:
        in_specs.append(pl.BlockSpec((TR, N), lambda i: (i, 0)))        # bias rows
    # Constant matrices: whole-array blocks, same block every step.
    in_specs += [
        pl.BlockSpec((D, ND), lambda i: (0, 0)),
        pl.BlockSpec((ND, N), lambda i: (0, 0)),
        pl.BlockSpec((N, ND), lambda i: (0, 0)),
        pl.BlockSpec((ND, D), lambda i: (0, 0)),
    ]

    kernel = functools.partial(
        _attn_rows_kernel,
        inv_scale=float(1.0 / math.sqrt(head_depth)),
        clip=None if clip is None else float(clip),
        has_mask=has_mask,
    )

    out2 = pl.pallas_call(
        kernel,
        out_shape=jax.ShapeDtypeStruct((R, D), Q.dtype),
        grid_spec=pltpu.PrefetchScalarGridSpec(
            num_scalar_prefetch=0,
            grid=grid,
            in_specs=in_specs,
            out_specs=pl.BlockSpec((TR, D), lambda i: (i, 0)),
        ),
        compiler_params=pltpu.CompilerParams(
            dimension_semantics=("parallel",),
            vmem_limit_bytes=vmem_limit,
        ),
    )(*args)

    return out2.reshape(B, H, C, 1, D)


def _reference(Q, K, V, mask=None, clip=None, head_depth=16):
    scale = math.sqrt(head_depth)
    logits = jnp.matmul(Q, jnp.swapaxes(K, -1, -2)) / scale
    if clip is not None:
        logits = clip * jnp.tanh(logits)
    if mask is not None:
        B, H, C = logits.shape[0], logits.shape[1], logits.shape[2]
        m = jnp.broadcast_to(mask[:, None, :, :, :], (B, H, C) + mask.shape[2:])
        m = jnp.swapaxes(m, -1, -2)
        logits = jnp.where(m, -1e10, logits)
    probs = jax.nn.softmax(logits, axis=-1)
    return jnp.matmul(probs, V)


if __name__ == "__main__":
    # Small shapes consistent with the module's docstring:
    # batch=2, n_heads=4, n_car=3, n_nodes=8, head_depth=16
    B, H, C, N, D = 2, 4, 3, 8, 16

    key = jax.random.PRNGKey(0)
    kq, kk, kv, km = jax.random.split(key, 4)
    Q = jax.random.normal(kq, (B, H, C, 1, D), dtype=jnp.float32)
    K = jax.random.normal(kk, (B, H, C, N, D), dtype=jnp.float32)
    V = jax.random.normal(kv, (B, H, C, N, D), dtype=jnp.float32)
    # mask: (B, n_car, n_nodes, 1); True == masked-out node (keep node 0 visible)
    mask = jax.random.bernoulli(km, 0.3, (B, C, N, 1))
    mask = mask.at[:, :, 0, :].set(False)

    # masked path
    out = jax.block_until_ready(dot_product_attention(Q, K, V, mask=mask, head_depth=D))
    ref = _reference(Q, K, V, mask=mask, head_depth=D)
    assert out.shape == (B, H, C, 1, D)
    assert jnp.allclose(out, ref, atol=1e-4, rtol=1e-4), "mismatch vs reference (mask)"

    # no-mask path
    out2 = jax.block_until_ready(dot_product_attention(Q, K, V, head_depth=D))
    ref2 = _reference(Q, K, V, head_depth=D)
    assert jnp.allclose(out2, ref2, atol=1e-4, rtol=1e-4), "mismatch vs reference (no mask)"

    # clip (tanh) path
    out3 = jax.block_until_ready(
        dot_product_attention(Q, K, V, mask=mask, clip=10.0, head_depth=D))
    ref3 = _reference(Q, K, V, mask=mask, clip=10.0, head_depth=D)
    assert jnp.allclose(out3, ref3, atol=1e-4, rtol=1e-4), "mismatch vs reference (clip)"

    print("KERNEL_OK")
</pallas_src>

<mosaic_0001>
module attributes {stable_mosaic.version = 11 : i64} {
  func.func @_attn_rows_kernel(%arg0: i32, %arg1: memref<16x16xf32, #tpu.memory_space<vmem>>, %arg2: memref<16x128xf32, #tpu.memory_space<vmem>>, %arg3: memref<16x128xf32, #tpu.memory_space<vmem>>, %arg4: memref<16x8xf32, #tpu.memory_space<vmem>>, %arg5: memref<16x128xf32, #tpu.memory_space<vmem>>, %arg6: memref<128x8xf32, #tpu.memory_space<vmem>>, %arg7: memref<8x128xf32, #tpu.memory_space<vmem>>, %arg8: memref<128x16xf32, #tpu.memory_space<vmem>>, %arg9: memref<16x16xf32, #tpu.memory_space<vmem>>) attributes {dimension_semantics = [#tpu.dimension_semantics<parallel>], iteration_bounds = array<i64: 2>, scalar_prefetch = 0 : i64, scratch_operands = 0 : i64, tpu.core_type = #tpu.core_type<tc>, window_params = [{transform_indices = @transform_0, window_bounds = array<i64: 16, 16>}, {transform_indices = @transform_1, window_bounds = array<i64: 16, 128>}, {transform_indices = @transform_2, window_bounds = array<i64: 16, 128>}, {transform_indices = @transform_3, window_bounds = array<i64: 16, 8>}, {pipeline_mode = #tpu.pipeline_mode<synchronous>, transform_indices = @transform_4, window_bounds = array<i64: 16, 128>}, {pipeline_mode = #tpu.pipeline_mode<synchronous>, transform_indices = @transform_5, window_bounds = array<i64: 128, 8>}, {pipeline_mode = #tpu.pipeline_mode<synchronous>, transform_indices = @transform_6, window_bounds = array<i64: 8, 128>}, {pipeline_mode = #tpu.pipeline_mode<synchronous>, transform_indices = @transform_7, window_bounds = array<i64: 128, 16>}, {transform_indices = @transform_8, window_bounds = array<i64: 16, 16>}]} {
    %c0 = arith.constant 0 : index
    %c0_0 = arith.constant 0 : index
    %0 = vector.load %arg1[%c0, %c0_0] : memref<16x16xf32, #tpu.memory_space<vmem>>, vector<16x16xf32>
    %cst = arith.constant 2.500000e-01 : f32
    %1 = vector.broadcast %cst : f32 to vector<16x16xf32>
    %2 = arith.mulf %0, %1 : vector<16x16xf32>
    %c0_1 = arith.constant 0 : index
    %c0_2 = arith.constant 0 : index
    %3 = vector.load %arg2[%c0_1, %c0_2] : memref<16x128xf32, #tpu.memory_space<vmem>>, vector<16x128xf32>
    %c0_3 = arith.constant 0 : index
    %c0_4 = arith.constant 0 : index
    %4 = vector.load %arg3[%c0_3, %c0_4] : memref<16x128xf32, #tpu.memory_space<vmem>>, vector<16x128xf32>
    %c0_5 = arith.constant 0 : index
    %c0_6 = arith.constant 0 : index
    %5 = vector.load %arg5[%c0_5, %c0_6] : memref<16x128xf32, #tpu.memory_space<vmem>>, vector<16x128xf32>
    %cst_7 = arith.constant dense<0.000000e+00> : vector<16x128xf32>
    %6 = tpu.matmul %2, %5, %cst_7 {dimension_numbers = #tpu.dot_dimension_numbers<[1], [0], [0], [1], [0, 0, 1, 1], [], []>} : vector<16x16xf32>, vector<16x128xf32>, vector<16x128xf32> -> vector<16x128xf32>
    %7 = arith.mulf %6, %3 : vector<16x128xf32>
    %c0_8 = arith.constant 0 : index
    %c0_9 = arith.constant 0 : index
    %8 = vector.load %arg6[%c0_8, %c0_9] : memref<128x8xf32, #tpu.memory_space<vmem>>, vector<128x8xf32>
    %cst_10 = arith.constant dense<0.000000e+00> : vector<16x8xf32>
    %9 = tpu.matmul %7, %8, %cst_10 {dimension_numbers = #tpu.dot_dimension_numbers<[1], [0], [0], [1], [0, 0, 1, 1], [], []>} : vector<16x128xf32>, vector<128x8xf32>, vector<16x8xf32> -> vector<16x8xf32>
    %c0_11 = arith.constant 0 : index
    %c0_12 = arith.constant 0 : index
    %10 = vector.load %arg4[%c0_11, %c0_12] : memref<16x8xf32, #tpu.memory_space<vmem>>, vector<16x8xf32>
    %11 = arith.addf %9, %10 : vector<16x8xf32>
    %cst_13 = arith.constant dense<0xFF800000> : vector<16xf32>
    %12 = vector.multi_reduction <maximumf>, %11, %cst_13 [1] : vector<16x8xf32> to vector<16xf32>
    %13 = vector.shape_cast %12 : vector<16xf32> to vector<16x1xf32>
    %14 = vector.broadcast %13 : vector<16x1xf32> to vector<16x8xf32>
    %15 = arith.subf %11, %14 : vector<16x8xf32>
    %16 = math.exp %15 : vector<16x8xf32>
    %cst_14 = arith.constant dense<0.000000e+00> : vector<16xf32>
    %17 = vector.multi_reduction <add>, %16, %cst_14 [1] : vector<16x8xf32> to vector<16xf32>
    %18 = vector.shape_cast %17 : vector<16xf32> to vector<16x1xf32>
    %19 = tpu.reciprocal %18 {approx = true} : vector<16x1xf32> -> vector<16x1xf32>
    %20 = arith.mulf %18, %19 : vector<16x1xf32>
    %cst_15 = arith.constant 2.000000e+00 : f32
    %21 = vector.broadcast %cst_15 : f32 to vector<16x1xf32>
    %22 = arith.subf %21, %20 : vector<16x1xf32>
    %23 = arith.mulf %19, %22 : vector<16x1xf32>
    %24 = vector.broadcast %23 : vector<16x1xf32> to vector<16x8xf32>
    %25 = arith.mulf %16, %24 : vector<16x8xf32>
    %c0_16 = arith.constant 0 : index
    %c0_17 = arith.constant 0 : index
    %26 = vector.load %arg7[%c0_16, %c0_17] : memref<8x128xf32, #tpu.memory_space<vmem>>, vector<8x128xf32>
    %cst_18 = arith.constant dense<0.000000e+00> : vector<16x128xf32>
    %27 = tpu.matmul %25, %26, %cst_18 {dimension_numbers = #tpu.dot_dimension_numbers<[1], [0], [0], [1], [0, 0, 1, 1], [], []>} : vector<16x8xf32>, vector<8x128xf32>, vector<16x128xf32> -> vector<16x128xf32>
    %28 = arith.mulf %27, %4 : vector<16x128xf32>
    %c0_19 = arith.constant 0 : index
    %c0_20 = arith.constant 0 : index
    %29 = vector.load %arg8[%c0_19, %c0_20] : memref<128x16xf32, #tpu.memory_space<vmem>>, vector<128x16xf32>
    %cst_21 = arith.constant dense<0.000000e+00> : vector<16x16xf32>
    %30 = tpu.matmul %28, %29, %cst_21 {dimension_numbers = #tpu.dot_dimension_numbers<[1], [0], [0], [1], [0, 0, 1, 1], [], []>} : vector<16x128xf32>, vector<128x16xf32>, vector<16x16xf32> -> vector<16x16xf32>
    %c0_22 = arith.constant 0 : index
    %c0_23 = arith.constant 0 : index
    %31 = vector.load %arg9[%c0_22, %c0_23] : memref<16x16xf32, #tpu.memory_space<vmem>>, vector<16x16xf32>
    tpu.vector_store %arg9[%c0_22, %c0_23], %30 {strides = array<i32>} : memref<16x16xf32, #tpu.memory_space<vmem>>, vector<16x16xf32>,
    return
  }
  func.func @transform_0(%arg0: i32) -> (i32, i32) {
    %c0_i32 = arith.constant 0 : i32
    %c0_i32_0 = arith.constant 0 : i32
    return %arg0, %c0_i32 : i32, i32
  }
  func.func @transform_1(%arg0: i32) -> (i32, i32) {
    %c0_i32 = arith.constant 0 : i32
    %c0_i32_0 = arith.constant 0 : i32
    return %arg0, %c0_i32 : i32, i32
  }
  func.func @transform_2(%arg0: i32) -> (i32, i32) {
    %c0_i32 = arith.constant 0 : i32
    %c0_i32_0 = arith.constant 0 : i32
    return %arg0, %c0_i32 : i32, i32
  }
  func.func @transform_3(%arg0: i32) -> (i32, i32) {
    %c0_i32 = arith.constant 0 : i32
    %c0_i32_0 = arith.constant 0 : i32
    return %arg0, %c0_i32 : i32, i32
  }
  func.func @transform_4(%arg0: i32) -> (i32, i32) {
    %c0_i32 = arith.constant 0 : i32
    %c0_i32_0 = arith.constant 0 : i32
    %c0_i32_1 = arith.constant 0 : i32
    return %c0_i32, %c0_i32_0 : i32, i32
  }
  func.func @transform_5(%arg0: i32) -> (i32, i32) {
    %c0_i32 = arith.constant 0 : i32
    %c0_i32_0 = arith.constant 0 : i32
    %c0_i32_1 = arith.constant 0 : i32
    return %c0_i32, %c0_i32_0 : i32, i32
  }
  func.func @transform_6(%arg0: i32) -> (i32, i32) {
    %c0_i32 = arith.constant 0 : i32
    %c0_i32_0 = arith.constant 0 : i32
    %c0_i32_1 = arith.constant 0 : i32
    return %c0_i32, %c0_i32_0 : i32, i32
  }
  func.func @transform_7(%arg0: i32) -> (i32, i32) {
    %c0_i32 = arith.constant 0 : i32
    %c0_i32_0 = arith.constant 0 : i32
    %c0_i32_1 = arith.constant 0 : i32
    return %c0_i32, %c0_i32_0 : i32, i32
  }
  func.func @transform_8(%arg0: i32) -> (i32, i32) {
    %c0_i32 = arith.constant 0 : i32
    %c0_i32_0 = arith.constant 0 : i32
    return %arg0, %c0_i32 : i32, i32
  }
}

</mosaic_0001>

<bundles_post_ra>
// kernel: tpu_custom_call.1
= control target key start
LH: loop header
LB: loop body
LE: loop exit
PB: predicated region body
PF: predicated region fallthrough
CT: control target
= control target key end

     0   :  { %s1560_s27 = smov 0   ;;  %s1562_s28 = smov 0   ;;  %s1773_s0 = inlined_call_operand.vmem [shape: f32[24,16], index: 0, kind: input, shape index: {}]   ;;  %s1774_s1 = inlined_call_operand.vmem [shape: f32[24,128], index: 1, kind: input, shape index: {}]   ;;  %s1775_s2 = inlined_call_operand.vmem [shape: f32[24,128], index: 2, kind: input, shape index: {}]   ;;  %s1776_s3 = inlined_call_operand.vmem [shape: f32[24,8], index: 3, kind: input, shape index: {}]   ;;  %s1777_s4 = inlined_call_operand.vmem [shape: f32[16,128], index: 4, kind: input, shape index: {}]   ;;  %s1778_s5 = inlined_call_operand.vmem [shape: f32[128,8], index: 5, kind: input, shape index: {}]   ;;  %s1779_s6 = inlined_call_operand.vmem [shape: f32[8,128], index: 6, kind: input, shape index: {}]   ;;  %s1780_s7 = inlined_call_operand.vmem [shape: f32[128,16], index: 7, kind: input, shape index: {}]   ;;  %s1781_s8 = inlined_call_operand.vmem [shape: f32[24,16], index: 8, kind: output, shape index: {}]  }
   0x1   :  { %s1564_s29 = smov 0  }
   0x2 LB: > { %s1573_s30 = sadd.s32 4294967295, %s1481_s29   ;;  %s1575_s9 = sadd.s32 1, %s1481_s29   ;;  %s1481_s29 = sphi %s1564_s29, %s1785_s29   ;;  %s1477_s28 = sphi %s1562_s28, %s1784_s28   ;;  %s1473_s27 = sphi %s1560_s27, %s1783_s27  }
   0x3   : > { %s210_s10 = ssub.s32 %s1481_s29, %s1575_s9  ;;  %s213_s11 = sadd.s32 1, %s1477_s28 }
   0x4   : > { %p211_p0 = scmp.eq.s32.totalorder %s210_s10, 0  ;;  %p223_p1 = scmp.ne.s32.totalorder %s1477_s28, %s1473_s27 }
   0x5   : > { %p224_p2 = scmp.eq.s32.totalorder %s1573_s30, 1  ;;  %p1104_p3 = scmp.ge.s32.totalorder %s1481_s29, 1 }
   0x6   : > { %s1583_s12 = scalar_select %p211_p0, %s1477_s28, %s213_s11  }
   0x7   : > { %p1585_p4 = por %p224_p2, %p223_p1  ;;  %p328_p5 = scmp.lt.s32.totalorder %s1481_s29, 3 }
   0x9   : > { %p329_p6 = pnand %p1104_p3, %p328_p5 }
   0xa   : > { %v461_v0 = vld [vmem:[%s1777_s4] sm:$0xff] (!%p329_p6)  ;;  %v462_v1 = vld [vmem:[%s1777_s4 + $0x8] sm:$0xff] (!%p329_p6)  ;;  %s1596_s18 = sshll.u32 (!%p329_p6), %s1573_s30, 1  ;;  %v549_v6 = vld [vmem:[%s1778_s5 + $0x10] sm:$0xff] (!%p329_p6)  ;;  %vm463_vm0 = vcmask (!%p329_p6), 130048   ;;  %vm640_vm1 = vcmask (!%p329_p6), 64512  }
   0xb   : > { %332 = sbr.rel (%p329_p6) target bundleno = 1260 (0x4ec), region = 52  ;;  %v547_v2 = vld [vmem:[%s1778_s5] sm:$0xff] (!%p329_p6)  ;;  %v1263_v3 = vpack.c.bf16 (!%p329_p6), %v462_v1, %v461_v0  ;;  %p397_p7 = scmp.lt.s32.totalorder (!%p329_p6), %s1596_s18, 2  ;;  %v548_v4 = vld [vmem:[%s1778_s5 + $0x8] sm:$0xff] (!%p329_p6)  ;;  %v550_v7 = vld [vmem:[%s1778_s5 + $0x18] sm:$0xff] (!%p329_p6) }
   0xc   : > { %v1267_v5 = vpack.c.bf16 (!%p329_p6), %v548_v4, %v547_v2  ;;  %v1271_v12 = vpack.c.bf16 (!%p329_p6), %v550_v7, %v549_v6  ;;  %v551_v13 = vld [vmem:[%s1778_s5 + $0x20] sm:$0xff] (!%p329_p6)  ;;  %v552_v14 = vld [vmem:[%s1778_s5 + $0x28] sm:$0xff] (!%p329_p6)  ;;  %v553_v16 = vld [vmem:[%s1778_s5 + $0x30] sm:$0xff] (!%p329_p6)  ;;  %s389_s11 = sand.u32 (!%p329_p6), 1, %s1473_s27  }
   0xd   : > { %1264 = vmatprep.subr.bf16.mxu1 (!%p329_p6), %v1263_v3  ;;  %v1275_v15 = vpack.c.bf16 (!%p329_p6), %v552_v14, %v551_v13  ;;  %v554_v17 = vld [vmem:[%s1778_s5 + $0x38] sm:$0xff] (!%p329_p6)  ;;  %v555_v19 = vld [vmem:[%s1778_s5 + $0x40] sm:$0xff] (!%p329_p6)  ;;  %v556_v20 = vld [vmem:[%s1778_s5 + $0x48] sm:$0xff] (!%p329_p6) }
   0xe   : > { %1266 = vmatpush3.bf16.msra.mxu1 (!%p329_p6), %v1263_v3  ;;  %v1279_v18 = vpack.c.bf16 (!%p329_p6), %v554_v17, %v553_v16  ;;  %v1283_v21 = vpack.c.bf16 (!%p329_p6), %v556_v20, %v555_v19  ;;  %v557_v22 = vld [vmem:[%s1778_s5 + $0x50] sm:$0xff] (!%p329_p6)  ;;  %v558_v23 = vld [vmem:[%s1778_s5 + $0x58] sm:$0xff] (!%p329_p6)  ;;  %v559_v25 = vld [vmem:[%s1778_s5 + $0x60] sm:$0xff] (!%p329_p6) }
   0xf   : > { %1268 = vmatprep.subr.bf16.mxu1 (!%p329_p6), %v1267_v5  ;;  %v1287_v24 = vpack.c.bf16 (!%p329_p6), %v558_v23, %v557_v22  ;;  %v560_v26 = vld [vmem:[%s1778_s5 + $0x68] sm:$0xff] (!%p329_p6)  ;;  %v561_v28 = vld [vmem:[%s1778_s5 + $0x70] sm:$0xff] (!%p329_p6)  ;;  %v562_v29 = vld [vmem:[%s1778_s5 + $0x78] sm:$0xff] (!%p329_p6) }
  0x10   : > { %v1291_v27 = vpack.c.bf16 (!%p329_p6), %v560_v26, %v559_v25  ;;  %v1295_v30 = vpack.c.bf16 (!%p329_p6), %v562_v29, %v561_v28  ;;  %v669_v55 = vld [vmem:[%s1779_s6] sm:$0xff] (!%p329_p6)  ;;  %v754_v57 = vld [vmem:[%s1780_s7 + $0x8] sm:$0xff] (!%p329_p6)  ;;  %v756_v6 = vld [vmem:[%s1780_s7 + $0x18] sm:$0xff] (!%p329_p6) }
  0x11   : > { %1223 = vmatprep.subr.mxu0 (!%p329_p6), %v669_v55  ;;  %v753_v56 = vld [vmem:[%s1780_s7] sm:$0xff] (!%p329_p6)  ;;  %v759_v13 = vld [vmem:[%s1780_s7 + $0x30] sm:$0xff] (!%p329_p6)  ;;  %v760_v14 = vld [vmem:[%s1780_s7 + $0x38] sm:$0xff] (!%p329_p6) }
  0x12   : > { %s398_s23 = scalar_select %p397_p7, %s1596_s18, 2  ;;  %1224 = vmatpush3.msra.mxu0 %v669_v55  ;;  %v1299_v58 = vpack.c.bf16 %v754_v57, %v753_v56  ;;  %v761_v16 = vld [vmem:[%s1780_s7 + $0x40] sm:$0xff]  ;;  %v762_v17 = vld [vmem:[%s1780_s7 + $0x48] sm:$0xff]  ;;  %v763_v19 = vld [vmem:[%s1780_s7 + $0x50] sm:$0xff] }
  0x13   : > { %v764_v20 = vld [vmem:[%s1780_s7 + $0x58] sm:$0xff]  ;;  %v765_v22 = vld [vmem:[%s1780_s7 + $0x60] sm:$0xff]  ;;  %v766_v23 = vld [vmem:[%s1780_s7 + $0x68] sm:$0xff]  ;;  %s1135_s16 = sshll.u32 (%p1585_p4), %s1573_s30, 4 }
  0x14   : > { %s1606_s24 = sshll.u32 %s398_s23, 3  ;;  %1300 = vmatprep.subr.bf16.mxu0 %v1299_v58  ;;  %v767_v25 = vld [vmem:[%s1780_s7 + $0x70] sm:$0xff]  ;;  %v768_v26 = vld [vmem:[%s1780_s7 + $0x78] sm:$0xff]  ;;  %s1739_s19 = scalar_lea.vmem (%p1585_p4), %s1781_s8, %s1135_s16  }
  0x15   : > { %s400_s29 = scalar_lea.vmem %s1773_s0, %s1606_s24  ;;  %s414_s14 = scalar_lea.vmem %s1774_s1, %s1606_s24 }
  0x16   : > { %v453_v8 = vld [vmem:[%s400_s29] sm:$0xff]  ;;  %v454_v9 = vld [vmem:[%s400_s29 + $0x8] sm:$0xff]  ;;  %s442_s17 = scalar_lea.vmem %s1776_s3, %s1606_s24  ;;  %s428_s10 = scalar_lea.vmem %s1775_s2, %s1606_s24 }
  0x17   : > { %v455_v10 = vmul.f32 0.25, %v453_v8  ;;  %v456_v11 = vmul.f32 0.25, %v454_v9  ;;  %v457_v31 = vld [vmem:[%s414_s14] sm:$0xff]  ;;  %v458_v32 = vld [vmem:[%s414_s14 + $0x8] sm:$0xff]  ;;  %s1105_s14 = sshll.u32 %s389_s11, 4  ;;  %s854_s24 = ssub.s32 (%p1585_p4), 3, %s1596_s18 }
  0x18   : > { %v563_v37 = vld [vmem:[%s442_s17] sm:$0xff]  ;;  %v564_v39 = vld [vmem:[%s442_s17 + $0x8] sm:$0xff]  ;;  %s1726_s15 = scalar_lea.vmem [#allocation2], %s1105_s14   ;;  %p855_p8 = scmp.lt.s32.totalorder (%p1585_p4), %s854_s24, 2 }
  0x19   : > { %1185 = vmatprep.mubr.msk.f32.mxu1 %vm463_vm0, %v455_v10  ;;  %v757_v10 = vld [vmem:[%s1780_s7 + $0x20] sm:$0xff]  ;;  %v460_v29 = vld [vmem:[%s428_s10 + $0x8] sm:$0xff] }
  0x1a   : > { %1186 = vmatmul.mubr.msk.f32.vlgmr.msra.gmra.mrb[0].mxu1 %vm463_vm0, %v456_v11  ;;  %v758_v11 = vld [vmem:[%s1780_s7 + $0x28] sm:$0xff]  ;;  %v459_v28 = vld [vmem:[%s428_s10] sm:$0xff] }
  0x1b   : > { %1270 = vmatpush3.bf16.msra.mxu1 %v1267_v5  ;;  %v755_v5 = vld [vmem:[%s1780_s7 + $0x10] sm:$0xff] }
  0x1c   : > { %1272 = vmatprep.subr.bf16.mxu1 %v1271_v12  ;;  %v1303_v9 = vpack.c.bf16 %v756_v6, %v755_v5 }
  0x1f   : > { %1274 = vmatpush3.bf16.msra.mxu1 %v1271_v12  ;;  %v1307_v12 = vpack.c.bf16 %v758_v11, %v757_v10 }
  0x20   : > { %1276 = vmatprep.subr.bf16.mxu1 %v1275_v15 }
  0x23   : > { %1278 = vmatpush3.bf16.msra.mxu1 %v1275_v15  ;;  %v1311_v15 = vpack.c.bf16 %v760_v14, %v759_v13 }
  0x24   : > { %1280 = vmatprep.subr.bf16.mxu1 %v1279_v18 }
  0x27   : > { %1282 = vmatpush3.bf16.msra.mxu1 %v1279_v18  ;;  %v1315_v18 = vpack.c.bf16 %v762_v17, %v761_v16 }
  0x28   : > { %1284 = vmatprep.subr.bf16.mxu1 %v1283_v21 }
  0x2b   : > { %1286 = vmatpush3.bf16.msra.mxu1 %v1283_v21  ;;  %v1319_v21 = vpack.c.bf16 %v764_v20, %v763_v19 }
  0x2c   : > { %1288 = vmatprep.subr.bf16.mxu1 %v1287_v24 }
  0x2f   : > { %1290 = vmatpush3.bf16.msra.mxu1 %v1287_v24  ;;  %v1323_v24 = vpack.c.bf16 %v766_v23, %v765_v22 }
  0x30   : > { %1292 = vmatprep.subr.bf16.mxu1 %v1291_v27 }
  0x33   : > { %1294 = vmatpush3.bf16.msra.mxu1 %v1291_v27  ;;  %v1327_v27 = vpack.c.bf16 %v768_v26, %v767_v25 }
  0x34   : > { %1296 = vmatprep.subr.bf16.mxu1 %v1295_v30 }
  0x37   : > { %1298 = vmatpush3.bf16.msra.mxu1 %v1295_v30 }
  0xed   : > { %v1187_v33 = vpop.f32.mrb[0].mxu1 }
  0xee   : > { %v536_v34 = vpop.f32.mrb[1].mxu1  ;;  %v546_v36 = vmul.f32 %v1187_v33, %v458_v32 }
  0xef   : > { %v545_v35 = vmul.f32 %v536_v34, %v457_v31 }
  0xf1   : > { %1220 = vmatprep.mubr.f32.mxu1 %v545_v35 }
  0xf2   : > { %1221 = vmatmul.mubr.f32.vlgmr.msra.gmra.mrb[2].mxu1 %v546_v36 }
 0x1c5   : > { %v1222_v38 = vpop.f32.mrb[2].mxu1 }
 0x1c6   : > { %v631_v40 = vpop.f32.mrb[3].mxu1  ;;  %v637_v42 = vadd.f32 %v1222_v38, %v564_v39 }
 0x1c7   : > { %v632_v41 = vadd.f32 %v631_v40, %v563_v37 }
 0x1c8   : > { %v644_v44 = vsel %vm640_vm1, %v637_v42, -inf }
 0x1c9   : > { %v641_v43 = vsel %vm640_vm1, %v632_v41, -inf }
 0x1ca   : > { %642 = vmax.xlane.f32.xlu0 %v641_v43 }
 0x1ce   : > { %645 = vmax.xlane.f32.xlu0 %v644_v44 }
 0x257   : > { %v643_v45 = vpop.xlane.xlu0 %642 }
 0x258   : > { %v647_v46 = vsub.f32 %v632_v41, %v643_v45 }
 0x25a   : > { %v649_v47 = vmul.f32 1.442695, %v647_v46 }
 0x25b   : > { %v646_v48 = vpop.xlane.xlu0 %645 }
 0x25c   : > { %1419 = vpow2.f32 %v649_v47  ;;  %v648_v49 = vsub.f32 %v637_v42, %v646_v48 }
 0x25e   : > { %v651_v50 = vmul.f32 1.442695, %v648_v49 }
 0x260   : > { %1421 = vpow2.f32 %v651_v50 }
 0x266   : > { %v1420_v51 = vpop.eup %1419 }
 0x267   : > { %v653_v52 = vsel %vm640_vm1, %v1420_v51, 0.0 }
 0x268   : > { %654 = vadd.xlane.f32.xlu1 %v653_v52 }
 0x26a   : > { %v1422_v53 = vpop.eup %1421 }
 0x26b   : > { %v656_v54 = vsel %vm640_vm1, %v1422_v53, 0.0 }
 0x26c   : > { %657 = vadd.xlane.f32.xlu1 %v656_v54 }
 0x2f5   : > { %v655_v59 = vpop.xlane.xlu1 %654 }
 0x2f6   : > { %1423 = vrcp.f32 %v655_v59 }
 0x2f9   : > { %v658_v60 = vpop.xlane.xlu1 %657 }
 0x2fa   : > { %1425 = vrcp.f32 %v658_v60 }
 0x300   : > { %v1424_v61 = vpop.eup %1423 }
 0x301   : > { %v661_v62 = vmul.f32 %v1424_v61, %v655_v59 }
 0x303   : > { %v663_v63 = vsub.f32 2.0, %v661_v62 }
 0x304   : > { %v1426_v0 = vpop.eup %1425 }
 0x305   : > { %v662_v1 = vmul.f32 %v1426_v0, %v658_v60  ;;  %v665_v2 = vmul.f32 %v1424_v61, %v663_v63 }
 0x307   : > { %v664_v3 = vsub.f32 2.0, %v662_v1  ;;  %v667_v4 = vmul.f32 %v1420_v51, %v665_v2 }
 0x309   : > { %v666_v7 = vmul.f32 %v1426_v0, %v664_v3  ;;  %1225 = vmatprep.mubr.msk.f32.mxu0 %vm640_vm1, %v667_v4 }
 0x30b   : > { %v668_v8 = vmul.f32 %v1422_v53, %v666_v7 }
 0x30d   : > { %1226 = vmatmul.mubr.msk.f32.vlgmr.msra.gmra.mrb[0].mxu0 %vm640_vm1, %v668_v8 }
 0x30e   : > { %1302 = vmatpush3.bf16.msra.mxu0 %v1299_v58 }
 0x30f   : > { %1304 = vmatprep.subr.bf16.mxu0 %v1303_v9 }
 0x312   : > { %1306 = vmatpush3.bf16.msra.mxu0 %v1303_v9 }
 0x313   : > { %1308 = vmatprep.subr.bf16.mxu0 %v1307_v12 }
 0x316   : > { %1310 = vmatpush3.bf16.msra.mxu0 %v1307_v12 }
 0x317   : > { %1312 = vmatprep.subr.bf16.mxu0 %v1311_v15 }
 0x31a   : > { %1314 = vmatpush3.bf16.msra.mxu0 %v1311_v15 }
 0x31b   : > { %1316 = vmatprep.subr.bf16.mxu0 %v1315_v18 }
 0x31e   : > { %1318 = vmatpush3.bf16.msra.mxu0 %v1315_v18 }
 0x31f   : > { %1320 = vmatprep.subr.bf16.mxu0 %v1319_v21 }
 0x322   : > { %1322 = vmatpush3.bf16.msra.mxu0 %v1319_v21 }
 0x323   : > { %1324 = vmatprep.subr.bf16.mxu0 %v1323_v24 }
 0x326   : > { %1326 = vmatpush3.bf16.msra.mxu0 %v1323_v24 }
 0x327   : > { %1328 = vmatprep.subr.bf16.mxu0 %v1327_v27 }
 0x32a   : > { %1330 = vmatpush3.bf16.msra.mxu0 %v1327_v27 }
 0x3e0   : > { %v1227_v30 = vpop.f32.mrb[0].mxu0 }
 0x3e1   : > { %v742_v31 = vpop.f32.mrb[1].mxu0  ;;  %v752_v33 = vmul.f32 %v1227_v30, %v460_v29 }
 0x3e2   : > { %v751_v32 = vmul.f32 %v742_v31, %v459_v28 }
 0x3e4   : > { %1260 = vmatprep.mubr.f32.mxu0 %v751_v32 }
 0x3e5   : > { %1261 = vmatmul.mubr.f32.vlgmr.msra.gmra.mrb[2].mxu0 %v752_v33 }
 0x4b4   : > { %852 = sbr.rel (!%p1585_p4) target bundleno = 1260 (0x4ec), region = 56 }
 0x4b8   : > { %v1262_v34 = vpop.f32.mrb[2].mxu0 }
 0x4b9   : > { %845 = vst.msk [vmem:[%s1726_s15 + $0x8] sm:$0xff] %vm463_vm0, %v1262_v34  ;;  %v835_v35 = vpop.f32.mrb[3].mxu0 }
 0x4ba   : > { %844 = vst.msk [vmem:[%s1726_s15] sm:$0xff] %vm463_vm0, %v835_v35 }
 0x4bb   : > { %s1787_s24 = smov (!%p855_p8, %s854_s24), 2 }
 0x4bc   : > { %s1120_s20 = sshll.u32 %s1787_s24, 7 }
 0x4bd   : > { %p1123_p9 = scmp.eq.s32.totalorder %s1120_s20, 0 }
 0x4be   : > { %s1745_s21 = sshrl.u32 (!%p1123_p9), %s1787_s24, 1 }
 0x4bf   : > { %863 = sbr.rel (%p1123_p9) target bundleno = 1260 (0x4ec), region = 60  ;;  %p1124_p10 = scmp.le.s32.totalorder (!%p1123_p9), %s1745_s21, 0 }
 0x4c6   : > { %1039 = sbr.rel (%p1124_p10) target bundleno = 1239 (0x4d7), region = 145  ;;  %s1483_s30 = smov (!%p1124_p10), %s1739_s19  }
 0x4c7   : > { %s1487_s13 = smov (!%p1124_p10), %s1726_s15   ;;  %s1491_s18 = smov (!%p1124_p10), 0  }
 0x4c8   : > { %s1495_s22 = smov (!%p1124_p10), 0  }
 0x4cd LB: >> { %v927_v36 = vld [vmem:[%s1489_s13] sm:$0xff]  ;;  %v929_v37 = vld [vmem:[%s1489_s13 + $0x8] sm:$0xff]  ;;  %s931_s23 = sadd.s32 1, %s1493_s18  ;;  %s921_s22 = sadd.s32 1, %s1497_s22   ;;  %s1497_s22 = sphi %s1495_s22, %s921_s22   ;;  %s1493_s18 = sphi %s1491_s18, %s1492_s18   ;;  %s1489_s13 = sphi %s1487_s13, %s936_s13   ;;  %s1485_s30 = sphi %s1483_s30, %s937_s30  }
 0x4ce   : >> { %928 = vst [vmem:[%s1485_s30] sm:$0xff] %v927_v36  ;;  %930 = vst [vmem:[%s1485_s30 + $0x8] sm:$0xff] %v929_v37  ;;  %p932_p11 = scmp.ge.s32.totalorder %s931_s23, %s1745_s21  ;;  %p920_p12 = scmp.ge.s32.totalorder %s921_s22, %s1745_s21 }
 0x4d0   : >> { %s1789_s23 = smov (%p932_p11, %s931_s23), 0  ;;  %923 = sbr.rel (!%p920_p12) target bundleno = 1229 (0x4cd), region = 151 }
 0x4d1   : >> { %s1125_s25 = sshll.u32 %s1789_s23, 4  ;;  %s1492_s18 = smov %s1789_s23  }
 0x4d2   : >> { %s936_s13 = scalar_lea.vmem %s1726_s15, %s1125_s25 [#allocation2]   ;;  %s937_s30 = scalar_lea.vmem %s1739_s19, %s1125_s25  }
 0x4d7 PF: > { %s1755_s26 = sand.u32 1, %s1787_s24   ;;  %s1136_s29 = sshll.u32 %s1745_s21, 4 }
 0x4d8   : > { %s942_s10 = scalar_lea.vmem %s1726_s15, %s1136_s29 [#allocation2]   ;;  %s944_s11 = scalar_lea.vmem %s1739_s19, %s1136_s29  }
 0x4d9   : > { %p1130_p13 = scmp.le.s32.totalorder %s1755_s26, 0 }
 0x4da   : > { %s1499_s14 = smov (!%p1130_p13), %s944_s11   ;;  %s1503_s16 = smov (!%p1130_p13), %s942_s10  }
 0x4db   : > { %1053 = sbr.rel (%p1130_p13) target bundleno = 1260 (0x4ec), region = 156  ;;  %s1507_s27 = smov (!%p1130_p13), 0  }
 0x4dc   : > { %s1511_s17 = smov (!%p1130_p13), 0  }
 0x4e2 LB: >> { %v954_v38 = vld [vmem:[%s1505_s16] sm:$0xff]  ;;  %s956_s24 = sadd.s32 1, %s1509_s27  ;;  %s948_s17 = sadd.s32 1, %s1513_s17   ;;  %s1513_s17 = sphi %s1511_s17, %s948_s17   ;;  %s1509_s27 = sphi %s1507_s27, %s1508_s27   ;;  %s1505_s16 = sphi %s1503_s16, %s961_s16   ;;  %s1501_s14 = sphi %s1499_s14, %s962_s14  }
 0x4e3   : >> { %955 = vst [vmem:[%s1501_s14] sm:$0xff] %v954_v38  ;;  %p957_p0 = scmp.ge.s32.totalorder %s956_s24, %s1755_s26  ;;  %p947_p1 = scmp.ge.s32.totalorder %s948_s17, %s1755_s26 }
 0x4e5   : >> { %s1791_s24 = smov (%p957_p0, %s956_s24), 0  ;;  %950 = sbr.rel (!%p947_p1) target bundleno = 1250 (0x4e2), region = 162 }
 0x4e6   : >> { %s1131_s15 = sshll.u32 %s1791_s24, 3  ;;  %s1508_s27 = smov %s1791_s24  }
 0x4e7   : >> { %s961_s16 = scalar_lea.vmem %s942_s10, %s1131_s15 [#allocation2]   ;;  %s962_s14 = scalar_lea.vmem %s944_s11, %s1131_s15  }
 0x4ec PF: > { %p15_p2 = scmp.ge.s32.totalorder %s1575_s9, 4   ;;  %s1783_s27 = smov %s1477_s28 }
 0x4ed   : > { %s1784_s28 = smov %s1583_s12  ;;  %s1785_s29 = smov %s1575_s9 }
 0x4ee   :  { %17 = sbr.rel (!%p15_p2) target bundleno = 2 (0x2), region = 173 }

</bundles_post_ra>
